<compile_context>
chip_gen: v7x
topology: tpu7x:2x2x1
jax: 0.10.0
libtpu: 0.0.40
codegen_flags: <defaults>
</compile_context>

<pallas_src>
import functools

import jax
import jax.numpy as jnp
from jax.experimental import pallas as pl
from jax.experimental.pallas import tpu as pltpu


def _cdiv(a, b):
    return -(-a // b)


def _round_up(a, b):
    return _cdiv(a, b) * b


# ---------------------------------------------------------------------------
# Kernels
# ---------------------------------------------------------------------------

def _gap_kernel_single(x_ref, o_ref, *, inv_hw):
    """Whole spatial extent in one block: reduce lanes, scale, store."""
    x = x_ref[...].astype(jnp.float32)
    o_ref[...] = (jnp.sum(x, axis=-1, keepdims=True) * inv_hw).astype(o_ref.dtype)


def _gap_kernel_packed(x_ref, sel_ref, o_ref, *, inv_hw):
    """Small-HW path: G spatial rows packed per lane-row (long contiguous DMA);
    segmented reduce via a block-diagonal ones matmul on the idle MXU."""
    x = x_ref[...].astype(jnp.float32)
    seg_sums = jnp.dot(x, sel_ref[...], preferred_element_type=jnp.float32)
    o_ref[...] = (seg_sums * inv_hw).astype(o_ref.dtype)


def _gap_kernel_split(x_ref, o_ref, acc_ref, *, hw, tile_hw, inv_hw):
    """Huge-HW path: spatial axis split across the last ('arbitrary') grid
    axis. Lane-dense f32 accumulator, pure VPU adds per step, one cross-lane
    reduce only in the epilogue. Input is unpadded: the tail block is masked."""
    k = pl.program_id(1)

    @pl.when(k == 0)
    def _():
        acc_ref[...] = jnp.zeros_like(acc_ref)

    x = x_ref[...].astype(jnp.float32)
    if hw % tile_hw != 0:
        # Zero the out-of-range lanes of the last spatial block (no host pad).
        rem = hw - k * tile_hw
        lane = jax.lax.broadcasted_iota(jnp.int32, x.shape, 1)
        x = jnp.where(lane < rem, x, 0.0)

    # Fold the block into 128-lane chunks with a tree of VPU adds
    # (no per-step XLU reduce, no masked narrow stores).
    parts = [x[:, j * 128:(j + 1) * 128] for j in range(tile_hw // 128)]
    while len(parts) > 1:
        nxt = [parts[i] + parts[i + 1] for i in range(0, len(parts) - 1, 2)]
        if len(parts) % 2:
            nxt.append(parts[-1])
        parts = nxt
    acc_ref[...] += parts[0]

    @pl.when(k == pl.num_programs(1) - 1)
    def _():
        o_ref[...] = (jnp.sum(acc_ref[...], axis=-1, keepdims=True)
                      * inv_hw).astype(o_ref.dtype)


# ---------------------------------------------------------------------------
# Tiling helpers
# ---------------------------------------------------------------------------

_MAX_ROWS_TILE = 32768     # sanity cap on the sublane (rows) block extent
_SMALL_HW_BYTES = 512      # below this, pack G spatial rows per lane-row
_PACK_SEG_BYTES = 1024     # target contiguous bytes per packed DMA segment
_MAX_PACK_G = 128
_SPLIT_CHUNKS = 64         # max 128-lane chunks per block in the split path


def _budgets():
    """Generation-aware (block byte budget, scoped-VMEM limit)."""
    vmem_phys = 64 * 1024 * 1024                      # conservative (v7x)
    try:
        vmem_phys = int(getattr(pltpu.get_tpu_info(), "vmem_capacity_bytes",
                                vmem_phys))
    except Exception:
        pass
    if vmem_phys >= 96 * 1024 * 1024:                 # v5e / v6e: 128 MiB
        return 16 * 1024 * 1024, 80 * 1024 * 1024
    return 8 * 1024 * 1024, 48 * 1024 * 1024          # v7x: 64 MiB physical


def _sublane(dtype):
    """Sublane packing multiple for the dtype (8 f32, 16 bf16, 32 int8)."""
    return max(8, 32 // jnp.dtype(dtype).itemsize)


def _row_tiling(rows, row_vmem_bytes, sub, target_bytes):
    """Split the rows (sublane) axis: tile is a multiple of `sub` (or == rows),
    byte-budgeted, and >= 2 blocks whenever possible (v7x megacore)."""
    if rows <= sub:
        return rows, 1
    rows_a = _round_up(rows, sub)
    cap = max(sub, (target_bytes // max(row_vmem_bytes, 1)) // sub * sub)
    cap = min(cap, _MAX_ROWS_TILE)
    if rows_a >= 2 * sub:                     # let both v7x TCs get a block
        cap = min(cap, _round_up(_cdiv(rows_a, 2), sub))
    rows_tile = min(rows_a, cap)
    n_rows = _cdiv(rows, rows_tile)
    rows_tile = min(_round_up(_cdiv(rows, n_rows), sub), rows_a)   # rebalance
    n_rows = _cdiv(rows, rows_tile)
    return rows_tile, n_rows


# ---------------------------------------------------------------------------
# Public wrapper
# ---------------------------------------------------------------------------

def global_avg_pool2d(x):
    """x: (N, C, H, W) -> (N, C), mean over H*W (== torch.mean(view, dim=2))."""
    N, C, H, W = x.shape
    rows, HW = N * C, H * W
    itemsize = jnp.dtype(x.dtype).itemsize
    sub = _sublane(x.dtype)
    # Integer inputs would truncate the mean; emit float32 for them instead.
    out_dtype = x.dtype if jnp.issubdtype(x.dtype, jnp.floating) else jnp.float32
    out_isz = jnp.dtype(out_dtype).itemsize
    inv_hw = 1.0 / float(HW)
    target_bytes, vmem_limit = _budgets()

    x_flat = x.reshape(rows, HW)

    # ---- path 1: small-HW packed segmented reduction (darknet 7x7 heads) ---
    if HW * itemsize < _SMALL_HW_BYTES and rows > 1:
        g_target = min(_MAX_PACK_G, _cdiv(_PACK_SEG_BYTES, HW * itemsize))
        g = 1
        for d in range(min(rows, g_target), 1, -1):
            if rows % d == 0:
                g = d
                break
        if g >= 2:
            rows_g = rows // g
            ghw = g * HW
            xp = x_flat.reshape(rows_g, ghw)          # free: contiguous view
            # Block-diagonal ones: sel[l, j] = 1 iff lane l belongs to segment j.
            sel = (jnp.arange(ghw, dtype=jnp.int32)[:, None] // HW
                   == jnp.arange(g, dtype=jnp.int32)[None, :]).astype(jnp.float32)
            row_bytes = _round_up(ghw, 128) * itemsize + 128 * out_isz
            rows_tile, n_rows = _row_tiling(rows_g, row_bytes, sub, target_bytes)
            out = pl.pallas_call(
                functools.partial(_gap_kernel_packed, inv_hw=inv_hw),
                out_shape=jax.ShapeDtypeStruct((rows_g, g), out_dtype),
                grid_spec=pltpu.PrefetchScalarGridSpec(
                    num_scalar_prefetch=0,
                    grid=(n_rows,),
                    in_specs=[
                        pl.BlockSpec((rows_tile, ghw), lambda r: (r, 0)),
                        pl.BlockSpec((ghw, g), lambda r: (0, 0)),
                    ],
                    out_specs=pl.BlockSpec((rows_tile, g), lambda r: (r, 0)),
                ),
                compiler_params=pltpu.CompilerParams(
                    dimension_semantics=("parallel",),
                    vmem_limit_bytes=vmem_limit,
                ),
            )(xp, sel)
            return out.reshape(N, C)

    # ---- path 2: whole spatial extent in one lane block (common case) ------
    hw_vmem = _round_up(HW, 128) * itemsize
    if min(rows, sub) * hw_vmem <= target_bytes:
        rows_tile, n_rows = _row_tiling(rows, hw_vmem + 128 * out_isz, sub,
                                        target_bytes)
        out = pl.pallas_call(
            functools.partial(_gap_kernel_single, inv_hw=inv_hw),
            out_shape=jax.ShapeDtypeStruct((rows, 1), out_dtype),
            grid_spec=pltpu.PrefetchScalarGridSpec(
                num_scalar_prefetch=0,
                grid=(n_rows,),
                in_specs=[pl.BlockSpec((rows_tile, HW), lambda r: (r, 0))],
                out_specs=pl.BlockSpec((rows_tile, 1), lambda r: (r, 0)),
            ),
            compiler_params=pltpu.CompilerParams(
                dimension_semantics=("parallel",),
                vmem_limit_bytes=vmem_limit,
            ),
        )(x_flat)
        return out.reshape(N, C)

    # ---- path 3: huge spatial extent -> split reduction across the grid ----
    row_bytes = _SPLIT_CHUNKS * 128 * itemsize + 128 * (4 + out_isz)
    rows_tile, n_rows = _row_tiling(rows, row_bytes, sub, target_bytes)
    tile_hw = max(128, (target_bytes // (rows_tile * itemsize)) // 128 * 128)
    tile_hw = min(tile_hw, _SPLIT_CHUNKS * 128)
    n_hw = _cdiv(HW, tile_hw)
    tile_hw = min(_round_up(_cdiv(HW, n_hw), 128), _SPLIT_CHUNKS * 128)
    n_hw = _cdiv(HW, tile_hw)
    assert tile_hw % 128 == 0

    kernel = functools.partial(_gap_kernel_split, hw=HW, tile_hw=tile_hw,
                               inv_hw=inv_hw)
    out = pl.pallas_call(
        kernel,
        out_shape=jax.ShapeDtypeStruct((rows, 1), out_dtype),
        grid_spec=pltpu.PrefetchScalarGridSpec(
            num_scalar_prefetch=0,
            grid=(n_rows, n_hw),
            in_specs=[pl.BlockSpec((rows_tile, tile_hw), lambda r, k: (r, k))],
            out_specs=pl.BlockSpec((rows_tile, 1), lambda r, k: (r, 0)),
            scratch_shapes=[pltpu.VMEM((rows_tile, 128), jnp.float32)],
        ),
        compiler_params=pltpu.CompilerParams(
            dimension_semantics=("parallel", "arbitrary"),
            vmem_limit_bytes=vmem_limit,
        ),
    )(x_flat)
    return out.reshape(N, C)


if __name__ == "__main__":
    k1, k2, k3, k4 = jax.random.split(jax.random.PRNGKey(0), 4)

    # 1) Primary small test (matches the module's expected usage).
    x = jax.random.normal(k1, (2, 4, 16, 16), dtype=jnp.float32)
    out = jax.block_until_ready(global_avg_pool2d(x))
    ref = jnp.mean(x.reshape(2, 4, -1), axis=2)
    assert out.shape == (2, 4)
    assert jnp.allclose(out, ref, atol=1e-5, rtol=1e-5)

    # 2) Odd N*C (15 rows): two row blocks, partial last block, no host pad.
    x2 = jax.random.normal(k2, (3, 5, 16, 16), dtype=jnp.float32)
    out2 = jax.block_until_ready(global_avg_pool2d(x2))
    ref2 = jnp.mean(x2.reshape(3, 5, -1), axis=2)
    assert out2.shape == (3, 5)
    assert jnp.allclose(out2, ref2, atol=1e-5, rtol=1e-5)

    # 3) Darknet-style 7x7 head: exercises the packed small-HW (MXU) path.
    x3 = jax.random.normal(k3, (2, 24, 7, 7), dtype=jnp.float32)
    out3 = jax.block_until_ready(global_avg_pool2d(x3))
    ref3 = jnp.mean(x3.reshape(2, 24, -1), axis=2)
    assert out3.shape == (2, 24)
    assert jnp.allclose(out3, ref3, atol=1e-5, rtol=1e-5)

    # 4) Large spatial extent with an unaligned tail: exercises the split
    #    (grid-reduction) path with the in-kernel tail mask.
    x4 = jax.random.normal(k4, (2, 4, 768, 705), dtype=jnp.float32)
    out4 = jax.block_until_ready(global_avg_pool2d(x4))
    ref4 = jnp.mean(x4.reshape(2, 4, -1), axis=2)
    assert out4.shape == (2, 4)
    assert jnp.allclose(out4, ref4, atol=1e-5, rtol=1e-4)

    print("KERNEL_OK")
</pallas_src>

<mosaic_0001>
module attributes {stable_mosaic.version = 11 : i64} {
  func.func @_gap_kernel_single(%arg0: i32, %arg1: memref<8x256xf32, #tpu.memory_space<vmem>>, %arg2: memref<8x1xf32, #tpu.memory_space<vmem>>) attributes {dimension_semantics = [#tpu.dimension_semantics<parallel>], iteration_bounds = array<i64: 1>, scalar_prefetch = 0 : i64, scratch_operands = 0 : i64, tpu.core_type = #tpu.core_type<tc>, window_params = [{transform_indices = @transform_0, window_bounds = array<i64: 8, 256>}, {transform_indices = @transform_1, window_bounds = array<i64: 8, 1>}]} {
    %c0 = arith.constant 0 : index
    %c0_0 = arith.constant 0 : index
    %0 = vector.load %arg1[%c0, %c0_0] : memref<8x256xf32, #tpu.memory_space<vmem>>, vector<8x256xf32>
    %cst = arith.constant dense<0.000000e+00> : vector<8xf32>
    %1 = vector.multi_reduction <add>, %0, %cst [1] : vector<8x256xf32> to vector<8xf32>
    %2 = vector.shape_cast %1 : vector<8xf32> to vector<8x1xf32>
    %cst_1 = arith.constant 3.906250e-03 : f32
    %3 = vector.broadcast %cst_1 : f32 to vector<8x1xf32>
    %4 = arith.mulf %2, %3 : vector<8x1xf32>
    %c0_2 = arith.constant 0 : index
    %c0_3 = arith.constant 0 : index
    %5 = vector.load %arg2[%c0_2, %c0_3] : memref<8x1xf32, #tpu.memory_space<vmem>>, vector<8x1xf32>
    tpu.vector_store %arg2[%c0_2, %c0_3], %4 {strides = array<i32>} : memref<8x1xf32, #tpu.memory_space<vmem>>, vector<8x1xf32>,
    return
  }
  func.func @transform_0(%arg0: i32) -> (i32, i32) {
    %c0_i32 = arith.constant 0 : i32
    %c0_i32_0 = arith.constant 0 : i32
    return %arg0, %c0_i32 : i32, i32
  }
  func.func @transform_1(%arg0: i32) -> (i32, i32) {
    %c0_i32 = arith.constant 0 : i32
    %c0_i32_0 = arith.constant 0 : i32
    return %arg0, %c0_i32 : i32, i32
  }
}

</mosaic_0001>

<bundles_post_ra>
// kernel: tpu_custom_call.1
= control target key start
LH: loop header
LB: loop body
LE: loop exit
PB: predicated region body
PF: predicated region fallthrough
CT: control target
= control target key end

     0   :  { %6 = vsyncpa [#allocation3], 0  ;;  %s58_s6 = smov [#allocation2]   ;;  %s84_s0 = inlined_call_operand.hbm [shape: f32[8,256], index: 0, kind: input, shape index: {}]   ;;  %s85_s1 = inlined_call_operand.vmem [shape: f32[8,1], index: 1, kind: output, shape index: {}]  }
   0x1   :  { %s13_s7 = sshll.u32 %s58_s6, 4  ;;  %s34_s10 = scalar_lea.hbm %s84_s0, 256  ;;  %s14_s7 = int_to_ptr.vmem [resolvable:$true] %s13_s7 }
   0x2   :  { %p35_p0 = scmp.ne.s32.totalorder %s84_s0, %s34_s10  ;;  %p38_p1 = scmp.lt.u32.totalorder %s34_s10, %s84_s0 }
   0x4   :  { %p40_p2 = pnand %p38_p1, %p35_p0 }
   0x6   :  { %43 = shalt.err (!%p40_p2)
}
   0x7   :  { %s44_s15 = scalar_lea.vmem %s14_s7, 256  ;;  %p49_p4 = scmp.lt.s32.totalorder %s14_s7, %s14_s7 }
   0x8   :  { %p45_p3 = scmp.ne.s32.totalorder %s14_s7, %s44_s15  ;;  %p50_p5 = scmp.lt.s32.totalorder %s44_s15, %s44_s15 }
   0xa   :  { %p51_p6 = por %p50_p5, %p49_p4 }
   0xc   :  { %p52_p7 = pnand %p51_p6, %p45_p3 }
   0xe   :  { %55 = shalt.err (!%p52_p7)
}
   0xf   :  { %16 = dma.hbm_to_vmem [thread:$0]  %s84_s0, 256, %s14_s7, [#allocation3]  }
  0x10   :  { %56 = dma.done.wait [#allocation3], 256  }
  0x11   :  { %57 = vsyncadd [#allocation3], 4294967040  ;;  %v20_v0 = vld [vmem:[#allocation2] sm:$0xff]  ;;  %v21_v1 = vld [vmem:[#allocation2 + $0x8] sm:$0xff]  ;;  %vm26_vm0 = vcmask 7168  }
  0x12   :  { %v22_v2 = vadd.f32 %v21_v1, %v20_v0 }
  0x14   :  { %23 = vadd.xlane.f32.xlu0 %v22_v2 }
  0xa1   :  { %v24_v3 = vpop.xlane.xlu0 %23 }
  0xa2   :  { %v25_v4 = vmul.f32 0.00390625, %v24_v3 }
  0xa4   :  { %27 = vst.msk [vmem:[%s85_s1] sm:$0xff] %vm26_vm0, %v25_v4 }
  0xa5   :  { %32 = vsyncpa [#allocation3], 1 }

</bundles_post_ra>
